<compile_context>
chip_gen: v7x
topology: tpu7x:2x2x1
jax: 0.10.0
libtpu: 0.0.40
codegen_flags: <defaults>
</compile_context>

<pallas_src>
import functools

import jax
import jax.numpy as jnp
from jax.experimental import pallas as pl
from jax.experimental.pallas import tpu as pltpu


def _round_up(x, m):
    return ((x + m - 1) // m) * m


# ---------------------------------------------------------------------------
# Kernels
# ---------------------------------------------------------------------------
def _kernel_single_k(x_ref, w_ref, b_ref, o_ref):
    """Whole K panel in one tile: no accumulator, no branches."""
    o_ref[...] = (
        jnp.dot(x_ref[...], w_ref[...], preferred_element_type=jnp.float32)
        + b_ref[...]
    ).astype(o_ref.dtype)


def _kernel_multi_k_f32(x_ref, w_ref, b_ref, o_ref):
    """f32 output: accumulate directly into the resident output block."""
    k = pl.program_id(2)

    @pl.when(k == 0)
    def _init():
        # Seed the accumulator with the broadcast bias -> no epilogue needed.
        o_ref[...] = jnp.broadcast_to(b_ref[...], o_ref.shape).astype(o_ref.dtype)

    o_ref[...] += jnp.dot(
        x_ref[...], w_ref[...], preferred_element_type=jnp.float32
    )


def _kernel_multi_k_acc(x_ref, w_ref, b_ref, o_ref, acc_ref):
    """Narrow output dtype: f32 VMEM scratch accumulator, single cast at end."""
    k = pl.program_id(2)

    @pl.when(k == 0)
    def _init():
        acc_ref[...] = jnp.broadcast_to(
            b_ref[...].astype(jnp.float32), acc_ref.shape
        )

    acc_ref[...] += jnp.dot(
        x_ref[...], w_ref[...], preferred_element_type=jnp.float32
    )

    @pl.when(k == pl.num_programs(2) - 1)
    def _epilogue():
        o_ref[...] = acc_ref[...].astype(o_ref.dtype)


# ---------------------------------------------------------------------------
# Wrapper
# ---------------------------------------------------------------------------
@functools.partial(
    jax.jit, static_argnames=("tm", "tn", "tk", "use_bf16_inputs")
)
def linear_projection(x, w, b, *, tm=256, tn=512, tk=512, use_bf16_inputs=False):
    """x: [M, K], w: [K, N], b: [N] -> [M, N] = x @ w + b."""
    M, K = x.shape
    Kw, N = w.shape
    assert K == Kw, (K, Kw)
    assert b.shape == (N,), b.shape

    out_dtype = x.dtype
    if use_bf16_inputs:
        x = x.astype(jnp.bfloat16)
        w = w.astype(jnp.bfloat16)

    # Clamp tiles to the (8,128)-rounded problem: tiny problems don't pad up
    # to a full large tile, and the K grid collapses whenever a full-K panel
    # fits the tile budget (tk >= K rounded to 128).
    tm_e = min(tm, _round_up(M, 8))
    tn_e = min(tn, _round_up(N, 128))
    tk_e = min(tk, _round_up(K, 128))

    Mp = _round_up(M, tm_e)
    Np = _round_up(N, tn_e)
    Kp = _round_up(K, tk_e)

    # Pad only when a dimension is actually unaligned. Zero-padding along K
    # is exact for the dot; padded output rows/cols are cropped below.
    xp = x if (Mp == M and Kp == K) else jnp.pad(x, ((0, Mp - M), (0, Kp - K)))
    wp = w if (Kp == K and Np == N) else jnp.pad(w, ((0, Kp - K), (0, Np - N)))
    bp = (b if Np == N else jnp.pad(b, (0, Np - N))).reshape(1, Np)

    gm, gn, gk = Mp // tm_e, Np // tn_e, Kp // tk_e
    grid = (gm, gn, gk)

    in_specs = [
        pl.BlockSpec((tm_e, tk_e), lambda i, j, k: (i, k)),   # x tile
        pl.BlockSpec((tk_e, tn_e), lambda i, j, k: (k, j)),   # w tile
        pl.BlockSpec((1, tn_e), lambda i, j, k: (0, j)),      # bias tile
    ]
    out_specs = pl.BlockSpec((tm_e, tn_e), lambda i, j, k: (i, j))

    if gk == 1:
        kernel = _kernel_single_k
        scratch_shapes = []
    elif jnp.dtype(out_dtype) == jnp.float32:
        kernel = _kernel_multi_k_f32
        scratch_shapes = []
    else:
        kernel = _kernel_multi_k_acc
        scratch_shapes = [pltpu.VMEM((tm_e, tn_e), jnp.float32)]

    in_itemsize = jnp.dtype(xp.dtype).itemsize
    out_itemsize = jnp.dtype(out_dtype).itemsize
    b_itemsize = jnp.dtype(bp.dtype).itemsize
    cost = pl.CostEstimate(
        flops=2 * Mp * Np * Kp,
        transcendentals=0,
        # x is re-streamed once per N-tile, w once per M-tile; the output
        # block is resident across k and written back once per (i, j).
        bytes_accessed=(
            Mp * Kp * in_itemsize * gn
            + Kp * Np * in_itemsize * gm
            + Np * b_itemsize * gm * gn
            + Mp * Np * out_itemsize
        ),
    )

    out_p = pl.pallas_call(
        kernel,
        out_shape=jax.ShapeDtypeStruct((Mp, Np), out_dtype),
        grid_spec=pltpu.PrefetchScalarGridSpec(
            num_scalar_prefetch=0,
            grid=grid,
            in_specs=in_specs,
            out_specs=out_specs,
            scratch_shapes=scratch_shapes,
        ),
        compiler_params=pltpu.CompilerParams(
            dimension_semantics=("parallel", "parallel", "arbitrary"),
            # Leave headroom under v7x's 64 MiB physical VMEM; well above the
            # scoped defaults (16 MiB v5e / 32 MiB v6e-v7x) so the larger
            # double-buffered tiles actually pipeline.
            vmem_limit_bytes=48 << 20,
        ),
        cost_estimate=cost,
    )(xp, wp, bp)

    return out_p[:M, :N]


if __name__ == "__main__":
    # Deterministic parameters matching the PyTorch module's __init__:
    #   self.w = torch.ones([5, 5]); self.b = torch.ones([5])
    w = jnp.ones((5, 5), dtype=jnp.float32)
    b = jnp.ones((5,), dtype=jnp.float32)

    # Dummy input consistent with get_dummy_input_tensor(): randn(3, 5)
    key = jax.random.PRNGKey(0)
    x = jax.random.normal(key, (3, 5), dtype=jnp.float32)

    out = jax.block_until_ready(linear_projection(x, w, b))
    ref = x @ w + b
    assert out.shape == (3, 5), out.shape
    assert jnp.allclose(out, ref, atol=1e-5, rtol=1e-5)

    # Multi-tile (gm > 1), single-K-step path.
    kx, kw, kb = jax.random.split(jax.random.PRNGKey(0), 3)
    xl = jax.random.normal(kx, (384, 320), dtype=jnp.float32)
    wl = jax.random.normal(kw, (320, 256), dtype=jnp.float32)
    bl = jax.random.normal(kb, (256,), dtype=jnp.float32)
    outl = jax.block_until_ready(linear_projection(xl, wl, bl))
    refl = xl @ wl + bl
    assert jnp.allclose(outl, refl, atol=1e-3, rtol=1e-3)

    # Multi-K-step path (gk > 1): direct accumulation into the f32 output.
    kx2, kw2, kb2 = jax.random.split(jax.random.PRNGKey(1), 3)
    xk = jax.random.normal(kx2, (256, 1536), dtype=jnp.float32)
    wk = jax.random.normal(kw2, (1536, 256), dtype=jnp.float32)
    bk = jax.random.normal(kb2, (256,), dtype=jnp.float32)
    outk = jax.block_until_ready(linear_projection(xk, wk, bk))
    refk = xk @ wk + bk
    assert jnp.allclose(outk, refk, atol=1e-2, rtol=1e-3)

    # Opt-in bf16 MXU inputs with f32 accumulation (looser tolerance).
    outb = jax.block_until_ready(linear_projection(xl, wl, bl, use_bf16_inputs=True))
    assert jnp.allclose(outb, refl, atol=1.0, rtol=5e-2)

    print("KERNEL_OK")
</pallas_src>

<mosaic_0001>
module attributes {stable_mosaic.version = 11 : i64} {
  func.func @_kernel_single_k(%arg0: i32, %arg1: i32, %arg2: i32, %arg3: memref<8x128xf32, #tpu.memory_space<vmem>>, %arg4: memref<128x128xf32, #tpu.memory_space<vmem>>, %arg5: memref<1x128xf32, #tpu.memory_space<vmem>>, %arg6: memref<8x128xf32, #tpu.memory_space<vmem>>) attributes {dimension_semantics = [#tpu.dimension_semantics<parallel>, #tpu.dimension_semantics<parallel>, #tpu.dimension_semantics<arbitrary>], iteration_bounds = array<i64: 1, 1, 1>, scalar_prefetch = 0 : i64, scratch_operands = 0 : i64, tpu.core_type = #tpu.core_type<tc>, window_params = [{transform_indices = @transform_0, window_bounds = array<i64: 8, 128>}, {transform_indices = @transform_1, window_bounds = array<i64: 128, 128>}, {transform_indices = @transform_2, window_bounds = array<i64: 1, 128>}, {transform_indices = @transform_3, window_bounds = array<i64: 8, 128>}]} {
    %c0 = arith.constant 0 : index
    %c0_0 = arith.constant 0 : index
    %0 = vector.load %arg3[%c0, %c0_0] : memref<8x128xf32, #tpu.memory_space<vmem>>, vector<8x128xf32>
    %c0_1 = arith.constant 0 : index
    %c0_2 = arith.constant 0 : index
    %1 = vector.load %arg4[%c0_1, %c0_2] : memref<128x128xf32, #tpu.memory_space<vmem>>, vector<128x128xf32>
    %cst = arith.constant dense<0.000000e+00> : vector<8x128xf32>
    %2 = tpu.matmul %0, %1, %cst {dimension_numbers = #tpu.dot_dimension_numbers<[1], [0], [0], [1], [0, 0, 1, 1], [], []>} : vector<8x128xf32>, vector<128x128xf32>, vector<8x128xf32> -> vector<8x128xf32>
    %c0_3 = arith.constant 0 : index
    %c0_4 = arith.constant 0 : index
    %3 = vector.load %arg5[%c0_3, %c0_4] : memref<1x128xf32, #tpu.memory_space<vmem>>, vector<1x128xf32>
    %4 = vector.broadcast %3 : vector<1x128xf32> to vector<8x128xf32>
    %5 = arith.addf %2, %4 : vector<8x128xf32>
    %c0_5 = arith.constant 0 : index
    %c0_6 = arith.constant 0 : index
    %6 = vector.load %arg6[%c0_5, %c0_6] : memref<8x128xf32, #tpu.memory_space<vmem>>, vector<8x128xf32>
    tpu.vector_store %arg6[%c0_5, %c0_6], %5 {strides = array<i32>} : memref<8x128xf32, #tpu.memory_space<vmem>>, vector<8x128xf32>,
    return
  }
  func.func @transform_0(%arg0: i32, %arg1: i32, %arg2: i32) -> (i32, i32) {
    %c0_i32 = arith.constant 0 : i32
    return %arg0, %arg2 : i32, i32
  }
  func.func @transform_1(%arg0: i32, %arg1: i32, %arg2: i32) -> (i32, i32) {
    %c0_i32 = arith.constant 0 : i32
    return %arg2, %arg1 : i32, i32
  }
  func.func @transform_2(%arg0: i32, %arg1: i32, %arg2: i32) -> (i32, i32) {
    %c0_i32 = arith.constant 0 : i32
    %c0_i32_0 = arith.constant 0 : i32
    return %c0_i32, %arg1 : i32, i32
  }
  func.func @transform_3(%arg0: i32, %arg1: i32, %arg2: i32) -> (i32, i32) {
    %c0_i32 = arith.constant 0 : i32
    return %arg0, %arg1 : i32, i32
  }
}

</mosaic_0001>

<bundles_post_ra>
// kernel: linear_projection.1
= control target key start
LH: loop header
LB: loop body
LE: loop exit
PB: predicated region body
PF: predicated region fallthrough
CT: control target
= control target key end

     0   :  { %v193_v0 = vmov 0.0|0.0   ;;  %vm194_vm0 = vmmov 0   ;;  %v195_v4 = vmov 0.0   ;;  %s273_s1 = inlined_call_operand.vmem [shape: f32[128,128], index: 1, kind: input, shape index: {}]   ;;  %s274_s0 = inlined_call_operand.vmem [shape: f32[8,128], index: 0, kind: input, shape index: {}]   ;;  %s275_s2 = inlined_call_operand.vmem [shape: f32[1,128], index: 2, kind: input, shape index: {}]   ;;  %s276_s3 = inlined_call_operand.vmem [shape: f32[8,128], index: 3, kind: output, shape index: {}]  }
   0x1   :  { %166 = vmatprep.subr.bf16.mxu0 %v193_v0  ;;  %v15_v1 = vld [vmem:[%s273_s1] sm:$0xff]  ;;  %v16_v2 = vld [vmem:[%s273_s1 + $0x8] sm:$0xff]  ;;  %v17_v3 = vld [vmem:[%s273_s1 + $0x10] sm:$0xff]  ;;  %163 = vmatprep.mubr.msk.f32.mxu0 %vm194_vm0, %v195_v4 }
   0x2   :  { %v167_v5 = vpack.c.bf16 %v16_v2, %v15_v1  ;;  %v18_v6 = vld [vmem:[%s273_s1 + $0x18] sm:$0xff]  ;;  %v19_v8 = vld [vmem:[%s273_s1 + $0x20] sm:$0xff]  ;;  %v20_v9 = vld [vmem:[%s273_s1 + $0x28] sm:$0xff] }
   0x3   :  { %v170_v7 = vpack.c.bf16 %v18_v6, %v17_v3  ;;  %v173_v10 = vpack.c.bf16 %v20_v9, %v19_v8  ;;  %v21_v11 = vld [vmem:[%s273_s1 + $0x30] sm:$0xff]  ;;  %v22_v12 = vld [vmem:[%s273_s1 + $0x38] sm:$0xff]  ;;  %v23_v14 = vld [vmem:[%s273_s1 + $0x40] sm:$0xff] }
   0x4   :  { %168 = vmatpush3.bf16.msra.mxu0 %v167_v5  ;;  %v176_v13 = vpack.c.bf16 %v22_v12, %v21_v11  ;;  %v24_v15 = vld [vmem:[%s273_s1 + $0x48] sm:$0xff]  ;;  %v25_v17 = vld [vmem:[%s273_s1 + $0x50] sm:$0xff]  ;;  %v26_v18 = vld [vmem:[%s273_s1 + $0x58] sm:$0xff] }
   0x5   :  { %169 = vmatprep.subr.bf16.mxu0 %v193_v0  ;;  %v179_v16 = vpack.c.bf16 %v24_v15, %v23_v14  ;;  %v182_v19 = vpack.c.bf16 %v26_v18, %v25_v17  ;;  %v27_v20 = vld [vmem:[%s273_s1 + $0x60] sm:$0xff]  ;;  %v28_v21 = vld [vmem:[%s273_s1 + $0x68] sm:$0xff]  ;;  %v29_v23 = vld [vmem:[%s273_s1 + $0x70] sm:$0xff] }
   0x6   :  { %v185_v22 = vpack.c.bf16 %v28_v21, %v27_v20  ;;  %v30_v24 = vld [vmem:[%s273_s1 + $0x78] sm:$0xff]  ;;  %v14_v26 = vld [vmem:[%s274_s0] sm:$0xff] }
   0x7   :  { %v188_v25 = vpack.c.bf16 %v30_v24, %v29_v23  ;;  %v113_v27 = vld [vmem:[%s275_s2] ss:$0 sm:$0xff] }
   0x8   :  { %171 = vmatpush3.bf16.msra.mxu0 %v170_v7 }
   0x9   :  { %172 = vmatprep.subr.bf16.mxu0 %v193_v0 }
   0xc   :  { %174 = vmatpush3.bf16.msra.mxu0 %v173_v10 }
   0xd   :  { %175 = vmatprep.subr.bf16.mxu0 %v193_v0 }
  0x10   :  { %177 = vmatpush3.bf16.msra.mxu0 %v176_v13 }
  0x11   :  { %178 = vmatprep.subr.bf16.mxu0 %v193_v0 }
  0x14   :  { %180 = vmatpush3.bf16.msra.mxu0 %v179_v16 }
  0x15   :  { %181 = vmatprep.subr.bf16.mxu0 %v193_v0 }
  0x18   :  { %183 = vmatpush3.bf16.msra.mxu0 %v182_v19 }
  0x19   :  { %184 = vmatprep.subr.bf16.mxu0 %v193_v0 }
  0x1c   :  { %186 = vmatpush3.bf16.msra.mxu0 %v185_v22 }
  0x1d   :  { %187 = vmatprep.subr.bf16.mxu0 %v193_v0 }
  0x20   :  { %189 = vmatpush3.bf16.msra.mxu0 %v188_v25 }
  0x23   :  { %164 = vmatmul.mubr.f32.vlgmr.msra.gmra.mrb[0].mxu0 %v14_v26 }
  0xf6   :  { %v104_v28 = vpop.f32.mrb[0].mxu0 }
  0xf7   :  { %v105_v29 = vadd.f32 %v113_v27, %v104_v28  ;;  %v165_v30 = vpop.f32.mrb[1].mxu0 }
  0xf9   :  { %108 = vst [vmem:[%s276_s3] sm:$0xff] %v105_v29 }

</bundles_post_ra>
